<compile_context>
chip_gen: v5e
topology: v5e:2x2
jax: 0.10.0
libtpu: 0.0.40
codegen_flags: <defaults>
</compile_context>

<pallas_src>
import functools

import jax
import jax.numpy as jnp
from jax.experimental import pallas as pl
from jax.experimental.pallas import tpu as pltpu


def _lstm_kernel(x_ref, wih_ref, whh_ref, b_ref, wout_ref, bout_ref,
                 out_ref, xp_ref, *, T, Bp, H):
    """Fused LSTM forward: input projection + recurrence + Linear + softmax."""
    G = 4 * H  # gate width (lane dim)

    # ---- prologue: project all T timesteps in ONE MXU pass, fold in bias ----
    # x_ref: (T*Bp, D) bf16, wih_ref: (D, G) bf16  ->  xp: (T*Bp, G) f32
    # (g-gate columns of wih/bias were pre-scaled by 2 in the wrapper)
    xp_ref[...] = (jnp.dot(x_ref[...], wih_ref[...],
                           preferred_element_type=jnp.float32)
                   + b_ref[...])

    whh = whh_ref[...]        # (G, G) bf16, hoisted out of the loop
    lane = jax.lax.broadcasted_iota(jnp.int32, (Bp, G), 1)
    is_g = (lane >= 2 * H) & (lane < 3 * H)    # g-gate lanes
    # tanh(x) = 2*sigmoid(2x) - 1; the 2x factor lives in the weights, so a
    # single sigmoid pass + one FMA produces all four gate activations.
    act_scale = jnp.where(is_g, 2.0, 1.0).astype(jnp.float32)   # hoisted
    act_off = jnp.where(is_g, -1.0, 0.0).astype(jnp.float32)    # hoisted

    def step(t, carry):
        # h, c carriers: (Bp, G) f32, valid data lives in lanes [H, 2H)
        # (the f-gate lane block); all other lanes hold bounded junk that is
        # killed by the zero rows of whh_pad / wout_pad.
        h, c = carry
        start = pl.multiple_of(t * Bp, Bp)
        gates = xp_ref[pl.ds(start, Bp), :] + jnp.dot(
            h.astype(jnp.bfloat16), whh, preferred_element_type=jnp.float32)

        # Single EUP transcendental; lane blocks of `act`: [ i | f | g | o ]
        act = jax.nn.sigmoid(gates) * act_scale + act_off
        # o-gate extraction: shift by 2H (half the 4H ring) -> [ g | o | i | f ],
        # identical for either hardware rotation direction.
        act_2h = pltpu.roll(act, 2 * H, axis=1)
        # i*g in lane block 1: roll(act,H)*roll(act,3H) gives [f*o|i*g|f*o|i*g]
        # for either rotation direction; both rolls depend only on `act` so
        # they issue back-to-back into the XLU (no XLU->VPU->XLU round-trip).
        ig_f = pltpu.roll(act, H, axis=1) * pltpu.roll(act, 3 * H, axis=1)
        c = act * c + ig_f                 # block 1: f*c + i*g  (= c_new)
        h = act_2h * jnp.tanh(c)           # block 1: o*tanh(c_new)
        return h, c

    z = jnp.zeros((Bp, G), jnp.float32)
    h_last, _ = jax.lax.fori_loop(0, T, step, (z, z), unroll=True)

    # ---- epilogue: Linear on the last hidden state + softmax (lane-dense) ----
    # wout_ref: (G, Dp) with zeros outside the valid D columns; bout_ref pad
    # lanes are -1e9 so exp() kills them and the softmax sum is unaffected.
    logits = (jnp.dot(h_last.astype(jnp.bfloat16), wout_ref[...],
                      preferred_element_type=jnp.float32)
              + bout_ref[...])             # (Bp, Dp)
    m = jnp.max(logits, axis=1, keepdims=True)
    e = jnp.exp(logits - m)
    out_ref[...] = e * pl.reciprocal(jnp.sum(e, axis=1, keepdims=True),
                                     approx=True)


def lstm_forward(seq, params):
    """seq: (B, T, board, board) float32.  Returns softmax probabilities (B, board*board)."""
    B, T, bs1, bs2 = seq.shape
    D = bs1 * bs2
    H = params["w_hh"].shape[1]
    G = 4 * H
    Bp = max(8, -(-B // 8) * 8)   # pad batch to a sublane multiple (>= 8)
    Dp = -(-D // 128) * 128       # lane-dense output width (>= 128)

    # Glue: flatten boards, go time-major, pad batch, flatten (T, Bp) -> rows.
    x = seq.reshape(B, T, D).astype(jnp.float32)
    x_tm = jnp.transpose(x, (1, 0, 2))                       # (T, B, D)
    x_tm = jnp.pad(x_tm, ((0, 0), (0, Bp - B), (0, 0)))      # (T, Bp, D)
    x2d = x_tm.reshape(T * Bp, D).astype(jnp.bfloat16)       # (T*Bp, D)

    # Fold the 2x of tanh(x)=2*sigmoid(2x)-1 into the g-gate rows (i,f,g,o
    # row-block ordering) of W_ih / W_hh and the g slice of the bias.
    g_scale = jnp.ones((G, 1), jnp.float32).at[2 * H:3 * H].set(2.0)
    wih_s = params["w_ih"] * g_scale                          # (G, D)
    whh_s = params["w_hh"] * g_scale                          # (G, H)
    b_all = ((params["b_ih"] + params["b_hh"]) * g_scale[:, 0]
             ).reshape(1, G).astype(jnp.float32)

    # Weights: pre-transposed, bf16 for the MXU.  W_hh^T / W_out^T are placed
    # in rows [H, 2H) of a 4H-row matrix (where the h carrier lives), zeros
    # elsewhere, so junk lanes of the state carriers contribute nothing.
    wih_t = wih_s.T.astype(jnp.bfloat16)                      # (D, G)
    whh_pad = (jnp.zeros((G, G), jnp.float32)
               .at[H:2 * H, :].set(whh_s.T)
               .astype(jnp.bfloat16))                         # (G, G)
    wout_pad = (jnp.zeros((G, Dp), jnp.float32)
                .at[H:2 * H, :D].set(params["w_out"].T)
                .astype(jnp.bfloat16))                        # (G, Dp)
    b_out = (jnp.full((1, Dp), -1e9, jnp.float32)
             .at[:, :D].set(params["b_out"].reshape(1, D)))   # (1, Dp)

    kernel = functools.partial(_lstm_kernel, T=T, Bp=Bp, H=H)
    out = pl.pallas_call(
        kernel,
        out_shape=jax.ShapeDtypeStruct((Bp, Dp), jnp.float32),
        # No grid: single invocation, whole arrays resident in VMEM.
        scratch_shapes=[pltpu.VMEM((T * Bp, G), jnp.float32)],  # pre-projected gates
    )(x2d, wih_t, whh_pad, b_all, wout_pad, b_out)
    return out[:B, :D]


def lstm_forward_ref(seq, params):
    """Pure-JAX f32 reference (same math as the PyTorch forward, eval mode)."""
    B, T, bs1, bs2 = seq.shape
    D = bs1 * bs2
    H = params["w_hh"].shape[1]
    x = seq.reshape(B, T, D).astype(jnp.float32)
    h = jnp.zeros((B, H), jnp.float32)
    c = jnp.zeros((B, H), jnp.float32)
    b = params["b_ih"] + params["b_hh"]
    for t in range(T):
        gates = x[:, t, :] @ params["w_ih"].T + h @ params["w_hh"].T + b
        i = jax.nn.sigmoid(gates[:, 0:H])
        f = jax.nn.sigmoid(gates[:, H:2 * H])
        g = jnp.tanh(gates[:, 2 * H:3 * H])
        o = jax.nn.sigmoid(gates[:, 3 * H:4 * H])
        c = f * c + i * g
        h = o * jnp.tanh(c)
    logits = h @ params["w_out"].T + params["b_out"]
    return jax.nn.softmax(logits, axis=1)


def init_params(key, board_size, hidden_dim):
    """Deterministic init mimicking PyTorch's U(-1/sqrt(H), 1/sqrt(H))."""
    D = board_size * board_size
    H = hidden_dim
    k = 1.0 / jnp.sqrt(jnp.float32(H))
    keys = jax.random.split(key, 6)
    u = lambda kk, shape: jax.random.uniform(kk, shape, jnp.float32, -k, k)
    return {
        "w_ih": u(keys[0], (4 * H, D)),
        "w_hh": u(keys[1], (4 * H, H)),
        "b_ih": u(keys[2], (4 * H,)),
        "b_hh": u(keys[3], (4 * H,)),
        "w_out": u(keys[4], (D, H)),
        "b_out": u(keys[5], (D,)),
    }


if __name__ == "__main__":
    BOARD = 8          # Othello board -> D = 64
    HIDDEN = 32
    B, T = 2, 8

    key = jax.random.PRNGKey(0)
    k_x, k_p = jax.random.split(key)
    # History of board states: (B, T, board, board)
    seq = jax.random.normal(k_x, (B, T, BOARD, BOARD), jnp.float32)
    params = init_params(k_p, BOARD, HIDDEN)

    out = jax.block_until_ready(lstm_forward(seq, params))
    ref = lstm_forward_ref(seq, params)

    assert out.shape == (B, BOARD * BOARD)
    # bf16 MXU operands + approx reciprocal -> looser tolerance than pure f32.
    if not jnp.allclose(out, ref, atol=5e-3, rtol=5e-2):
        max_err = float(jnp.max(jnp.abs(out - ref)))
        raise AssertionError(f"Pallas output mismatch vs reference (max abs err {max_err})")
    print("KERNEL_OK")
</pallas_src>

<mosaic_0001>
module attributes {stable_mosaic.version = 11 : i64} {
  func.func @_lstm_kernel(%arg0: memref<64x64xbf16, #tpu.memory_space<vmem>>, %arg1: memref<64x128xbf16, #tpu.memory_space<vmem>>, %arg2: memref<128x128xbf16, #tpu.memory_space<vmem>>, %arg3: memref<1x128xf32, #tpu.memory_space<vmem>>, %arg4: memref<128x128xbf16, #tpu.memory_space<vmem>>, %arg5: memref<1x128xf32, #tpu.memory_space<vmem>>, %arg6: memref<8x128xf32, #tpu.memory_space<vmem>>, %arg7: memref<64x128xf32, #tpu.memory_space<vmem>>) attributes {dimension_semantics = [], scalar_prefetch = 0 : i64, scratch_operands = 1 : i64, tpu.core_type = #tpu.core_type<tc>} {
    %c0 = arith.constant 0 : index
    %c0_0 = arith.constant 0 : index
    %0 = vector.load %arg0[%c0, %c0_0] : memref<64x64xbf16, #tpu.memory_space<vmem>>, vector<64x64xbf16>
    %c0_1 = arith.constant 0 : index
    %c0_2 = arith.constant 0 : index
    %1 = vector.load %arg1[%c0_1, %c0_2] : memref<64x128xbf16, #tpu.memory_space<vmem>>, vector<64x128xbf16>
    %cst = arith.constant dense<0.000000e+00> : vector<64x128xf32>
    %2 = tpu.matmul %0, %1, %cst {dimension_numbers = #tpu.dot_dimension_numbers<[1], [0], [0], [1], [0, 0, 1, 1], [], []>} : vector<64x64xbf16>, vector<64x128xbf16>, vector<64x128xf32> -> vector<64x128xf32>
    %c0_3 = arith.constant 0 : index
    %c0_4 = arith.constant 0 : index
    %3 = vector.load %arg3[%c0_3, %c0_4] : memref<1x128xf32, #tpu.memory_space<vmem>>, vector<1x128xf32>
    %4 = vector.broadcast %3 : vector<1x128xf32> to vector<64x128xf32>
    %5 = arith.addf %2, %4 : vector<64x128xf32>
    %c0_5 = arith.constant 0 : index
    %c0_6 = arith.constant 0 : index
    %6 = vector.load %arg7[%c0_5, %c0_6] : memref<64x128xf32, #tpu.memory_space<vmem>>, vector<64x128xf32>
    tpu.vector_store %arg7[%c0_5, %c0_6], %5 {strides = array<i32>} : memref<64x128xf32, #tpu.memory_space<vmem>>, vector<64x128xf32>,
    %c0_7 = arith.constant 0 : index
    %c0_8 = arith.constant 0 : index
    %7 = vector.load %arg2[%c0_7, %c0_8] : memref<128x128xbf16, #tpu.memory_space<vmem>>, vector<128x128xbf16>
    %8 = tpu.iota {dimensions = array<i32: 1>} : vector<8x128xi32>
    %c64_i32 = arith.constant 64 : i32
    %9 = vector.broadcast %c64_i32 : i32 to vector<8x128xi32>
    %10 = arith.cmpi sge, %8, %9 : vector<8x128xi32>
    %c96_i32 = arith.constant 96 : i32
    %11 = vector.broadcast %c96_i32 : i32 to vector<8x128xi32>
    %12 = arith.cmpi slt, %8, %11 : vector<8x128xi32>
    %13 = arith.andi %10, %12 : vector<8x128xi1>
    %cst_9 = arith.constant 2.000000e+00 : f32
    %cst_10 = arith.constant 1.000000e+00 : f32
    %14 = vector.broadcast %cst_9 : f32 to vector<8x128xf32>
    %15 = vector.broadcast %cst_10 : f32 to vector<8x128xf32>
    %16 = arith.select %13, %14, %15 : vector<8x128xi1>, vector<8x128xf32>
    %cst_11 = arith.constant -1.000000e+00 : f32
    %cst_12 = arith.constant 0.000000e+00 : f32
    %17 = vector.broadcast %cst_11 : f32 to vector<8x128xf32>
    %18 = vector.broadcast %cst_12 : f32 to vector<8x128xf32>
    %19 = arith.select %13, %17, %18 : vector<8x128xi1>, vector<8x128xf32>
    %cst_13 = arith.constant 0.000000e+00 : f32
    %20 = vector.broadcast %cst_13 : f32 to vector<8x128xf32>
    %c0_i32 = arith.constant 0 : i32
    %c8_i32 = arith.constant 8 : i32
    %21 = arith.muli %c0_i32, %c8_i32 : i32
    %22 = tpu.assume_multiple %21, 8 : i32
    %23 = arith.index_cast %22 : i32 to index
    %c0_14 = arith.constant 0 : index
    %24 = vector.load %arg7[%23, %c0_14] : memref<64x128xf32, #tpu.memory_space<vmem>>, vector<8x128xf32>
    %25 = arith.truncf %20 : vector<8x128xf32> to vector<8x128xbf16>
    %cst_15 = arith.constant dense<0.000000e+00> : vector<8x128xf32>
    %26 = tpu.matmul %25, %7, %cst_15 {dimension_numbers = #tpu.dot_dimension_numbers<[1], [0], [0], [1], [0, 0, 1, 1], [], []>} : vector<8x128xbf16>, vector<128x128xbf16>, vector<8x128xf32> -> vector<8x128xf32>
    %27 = arith.addf %24, %26 : vector<8x128xf32>
    %28 = arith.negf %27 : vector<8x128xf32>
    %29 = math.exp %28 : vector<8x128xf32>
    %cst_16 = arith.constant 1.000000e+00 : f32
    %30 = vector.broadcast %cst_16 : f32 to vector<8x128xf32>
    %31 = arith.addf %30, %29 : vector<8x128xf32>
    %32 = arith.divf %30, %31 : vector<8x128xf32>
    %33 = arith.mulf %32, %16 : vector<8x128xf32>
    %34 = arith.addf %33, %19 : vector<8x128xf32>
    %c64_i32_17 = arith.constant 64 : i32
    %35 = tpu.dynamic_rotate %34 by %c64_i32_17 dim 1 : vector<8x128xf32>, i32 -> vector<8x128xf32>
    %c32_i32 = arith.constant 32 : i32
    %36 = tpu.dynamic_rotate %34 by %c32_i32 dim 1 : vector<8x128xf32>, i32 -> vector<8x128xf32>
    %c96_i32_18 = arith.constant 96 : i32
    %37 = tpu.dynamic_rotate %34 by %c96_i32_18 dim 1 : vector<8x128xf32>, i32 -> vector<8x128xf32>
    %38 = arith.mulf %36, %37 : vector<8x128xf32>
    %39 = arith.mulf %34, %20 : vector<8x128xf32>
    %40 = arith.addf %39, %38 : vector<8x128xf32>
    %41 = math.tanh %40 : vector<8x128xf32>
    %42 = arith.mulf %35, %41 : vector<8x128xf32>
    %c1_i32 = arith.constant 1 : i32
    %c8_i32_19 = arith.constant 8 : i32
    %43 = arith.muli %c1_i32, %c8_i32_19 : i32
    %44 = tpu.assume_multiple %43, 8 : i32
    %45 = arith.index_cast %44 : i32 to index
    %c0_20 = arith.constant 0 : index
    %46 = vector.load %arg7[%45, %c0_20] : memref<64x128xf32, #tpu.memory_space<vmem>>, vector<8x128xf32>
    %47 = arith.truncf %42 : vector<8x128xf32> to vector<8x128xbf16>
    %cst_21 = arith.constant dense<0.000000e+00> : vector<8x128xf32>
    %48 = tpu.matmul %47, %7, %cst_21 {dimension_numbers = #tpu.dot_dimension_numbers<[1], [0], [0], [1], [0, 0, 1, 1], [], []>} : vector<8x128xbf16>, vector<128x128xbf16>, vector<8x128xf32> -> vector<8x128xf32>
    %49 = arith.addf %46, %48 : vector<8x128xf32>
    %50 = arith.negf %49 : vector<8x128xf32>
    %51 = math.exp %50 : vector<8x128xf32>
    %cst_22 = arith.constant 1.000000e+00 : f32
    %52 = vector.broadcast %cst_22 : f32 to vector<8x128xf32>
    %53 = arith.addf %52, %51 : vector<8x128xf32>
    %54 = arith.divf %52, %53 : vector<8x128xf32>
    %55 = arith.mulf %54, %16 : vector<8x128xf32>
    %56 = arith.addf %55, %19 : vector<8x128xf32>
    %c64_i32_23 = arith.constant 64 : i32
    %57 = tpu.dynamic_rotate %56 by %c64_i32_23 dim 1 : vector<8x128xf32>, i32 -> vector<8x128xf32>
    %c32_i32_24 = arith.constant 32 : i32
    %58 = tpu.dynamic_rotate %56 by %c32_i32_24 dim 1 : vector<8x128xf32>, i32 -> vector<8x128xf32>
    %c96_i32_25 = arith.constant 96 : i32
    %59 = tpu.dynamic_rotate %56 by %c96_i32_25 dim 1 : vector<8x128xf32>, i32 -> vector<8x128xf32>
    %60 = arith.mulf %58, %59 : vector<8x128xf32>
    %61 = arith.mulf %56, %40 : vector<8x128xf32>
    %62 = arith.addf %61, %60 : vector<8x128xf32>
    %63 = math.tanh %62 : vector<8x128xf32>
    %64 = arith.mulf %57, %63 : vector<8x128xf32>
    %c2_i32 = arith.constant 2 : i32
    %c8_i32_26 = arith.constant 8 : i32
    %65 = arith.muli %c2_i32, %c8_i32_26 : i32
    %66 = tpu.assume_multiple %65, 8 : i32
    %67 = arith.index_cast %66 : i32 to index
    %c0_27 = arith.constant 0 : index
    %68 = vector.load %arg7[%67, %c0_27] : memref<64x128xf32, #tpu.memory_space<vmem>>, vector<8x128xf32>
    %69 = arith.truncf %64 : vector<8x128xf32> to vector<8x128xbf16>
    %cst_28 = arith.constant dense<0.000000e+00> : vector<8x128xf32>
    %70 = tpu.matmul %69, %7, %cst_28 {dimension_numbers = #tpu.dot_dimension_numbers<[1], [0], [0], [1], [0, 0, 1, 1], [], []>} : vector<8x128xbf16>, vector<128x128xbf16>, vector<8x128xf32> -> vector<8x128xf32>
    %71 = arith.addf %68, %70 : vector<8x128xf32>
    %72 = arith.negf %71 : vector<8x128xf32>
    %73 = math.exp %72 : vector<8x128xf32>
    %cst_29 = arith.constant 1.000000e+00 : f32
    %74 = vector.broadcast %cst_29 : f32 to vector<8x128xf32>
    %75 = arith.addf %74, %73 : vector<8x128xf32>
    %76 = arith.divf %74, %75 : vector<8x128xf32>
    %77 = arith.mulf %76, %16 : vector<8x128xf32>
    %78 = arith.addf %77, %19 : vector<8x128xf32>
    %c64_i32_30 = arith.constant 64 : i32
    %79 = tpu.dynamic_rotate %78 by %c64_i32_30 dim 1 : vector<8x128xf32>, i32 -> vector<8x128xf32>
    %c32_i32_31 = arith.constant 32 : i32
    %80 = tpu.dynamic_rotate %78 by %c32_i32_31 dim 1 : vector<8x128xf32>, i32 -> vector<8x128xf32>
    %c96_i32_32 = arith.constant 96 : i32
    %81 = tpu.dynamic_rotate %78 by %c96_i32_32 dim 1 : vector<8x128xf32>, i32 -> vector<8x128xf32>
    %82 = arith.mulf %80, %81 : vector<8x128xf32>
    %83 = arith.mulf %78, %62 : vector<8x128xf32>
    %84 = arith.addf %83, %82 : vector<8x128xf32>
    %85 = math.tanh %84 : vector<8x128xf32>
    %86 = arith.mulf %79, %85 : vector<8x128xf32>
    %c3_i32 = arith.constant 3 : i32
    %c8_i32_33 = arith.constant 8 : i32
    %87 = arith.muli %c3_i32, %c8_i32_33 : i32
    %88 = tpu.assume_multiple %87, 8 : i32
    %89 = arith.index_cast %88 : i32 to index
    %c0_34 = arith.constant 0 : index
    %90 = vector.load %arg7[%89, %c0_34] : memref<64x128xf32, #tpu.memory_space<vmem>>, vector<8x128xf32>
    %91 = arith.truncf %86 : vector<8x128xf32> to vector<8x128xbf16>
    %cst_35 = arith.constant dense<0.000000e+00> : vector<8x128xf32>
    %92 = tpu.matmul %91, %7, %cst_35 {dimension_numbers = #tpu.dot_dimension_numbers<[1], [0], [0], [1], [0, 0, 1, 1], [], []>} : vector<8x128xbf16>, vector<128x128xbf16>, vector<8x128xf32> -> vector<8x128xf32>
    %93 = arith.addf %90, %92 : vector<8x128xf32>
    %94 = arith.negf %93 : vector<8x128xf32>
    %95 = math.exp %94 : vector<8x128xf32>
    %cst_36 = arith.constant 1.000000e+00 : f32
    %96 = vector.broadcast %cst_36 : f32 to vector<8x128xf32>
    %97 = arith.addf %96, %95 : vector<8x128xf32>
    %98 = arith.divf %96, %97 : vector<8x128xf32>
    %99 = arith.mulf %98, %16 : vector<8x128xf32>
    %100 = arith.addf %99, %19 : vector<8x128xf32>
    %c64_i32_37 = arith.constant 64 : i32
    %101 = tpu.dynamic_rotate %100 by %c64_i32_37 dim 1 : vector<8x128xf32>, i32 -> vector<8x128xf32>
    %c32_i32_38 = arith.constant 32 : i32
    %102 = tpu.dynamic_rotate %100 by %c32_i32_38 dim 1 : vector<8x128xf32>, i32 -> vector<8x128xf32>
    %c96_i32_39 = arith.constant 96 : i32
    %103 = tpu.dynamic_rotate %100 by %c96_i32_39 dim 1 : vector<8x128xf32>, i32 -> vector<8x128xf32>
    %104 = arith.mulf %102, %103 : vector<8x128xf32>
    %105 = arith.mulf %100, %84 : vector<8x128xf32>
    %106 = arith.addf %105, %104 : vector<8x128xf32>
    %107 = math.tanh %106 : vector<8x128xf32>
    %108 = arith.mulf %101, %107 : vector<8x128xf32>
    %c4_i32 = arith.constant 4 : i32
    %c8_i32_40 = arith.constant 8 : i32
    %109 = arith.muli %c4_i32, %c8_i32_40 : i32
    %110 = tpu.assume_multiple %109, 8 : i32
    %111 = arith.index_cast %110 : i32 to index
    %c0_41 = arith.constant 0 : index
    %112 = vector.load %arg7[%111, %c0_41] : memref<64x128xf32, #tpu.memory_space<vmem>>, vector<8x128xf32>
    %113 = arith.truncf %108 : vector<8x128xf32> to vector<8x128xbf16>
    %cst_42 = arith.constant dense<0.000000e+00> : vector<8x128xf32>
    %114 = tpu.matmul %113, %7, %cst_42 {dimension_numbers = #tpu.dot_dimension_numbers<[1], [0], [0], [1], [0, 0, 1, 1], [], []>} : vector<8x128xbf16>, vector<128x128xbf16>, vector<8x128xf32> -> vector<8x128xf32>
    %115 = arith.addf %112, %114 : vector<8x128xf32>
    %116 = arith.negf %115 : vector<8x128xf32>
    %117 = math.exp %116 : vector<8x128xf32>
    %cst_43 = arith.constant 1.000000e+00 : f32
    %118 = vector.broadcast %cst_43 : f32 to vector<8x128xf32>
    %119 = arith.addf %118, %117 : vector<8x128xf32>
    %120 = arith.divf %118, %119 : vector<8x128xf32>
    %121 = arith.mulf %120, %16 : vector<8x128xf32>
    %122 = arith.addf %121, %19 : vector<8x128xf32>
    %c64_i32_44 = arith.constant 64 : i32
    %123 = tpu.dynamic_rotate %122 by %c64_i32_44 dim 1 : vector<8x128xf32>, i32 -> vector<8x128xf32>
    %c32_i32_45 = arith.constant 32 : i32
    %124 = tpu.dynamic_rotate %122 by %c32_i32_45 dim 1 : vector<8x128xf32>, i32 -> vector<8x128xf32>
    %c96_i32_46 = arith.constant 96 : i32
    %125 = tpu.dynamic_rotate %122 by %c96_i32_46 dim 1 : vector<8x128xf32>, i32 -> vector<8x128xf32>
    %126 = arith.mulf %124, %125 : vector<8x128xf32>
    %127 = arith.mulf %122, %106 : vector<8x128xf32>
    %128 = arith.addf %127, %126 : vector<8x128xf32>
    %129 = math.tanh %128 : vector<8x128xf32>
    %130 = arith.mulf %123, %129 : vector<8x128xf32>
    %c5_i32 = arith.constant 5 : i32
    %c8_i32_47 = arith.constant 8 : i32
    %131 = arith.muli %c5_i32, %c8_i32_47 : i32
    %132 = tpu.assume_multiple %131, 8 : i32
    %133 = arith.index_cast %132 : i32 to index
    %c0_48 = arith.constant 0 : index
    %134 = vector.load %arg7[%133, %c0_48] : memref<64x128xf32, #tpu.memory_space<vmem>>, vector<8x128xf32>
    %135 = arith.truncf %130 : vector<8x128xf32> to vector<8x128xbf16>
    %cst_49 = arith.constant dense<0.000000e+00> : vector<8x128xf32>
    %136 = tpu.matmul %135, %7, %cst_49 {dimension_numbers = #tpu.dot_dimension_numbers<[1], [0], [0], [1], [0, 0, 1, 1], [], []>} : vector<8x128xbf16>, vector<128x128xbf16>, vector<8x128xf32> -> vector<8x128xf32>
    %137 = arith.addf %134, %136 : vector<8x128xf32>
    %138 = arith.negf %137 : vector<8x128xf32>
    %139 = math.exp %138 : vector<8x128xf32>
    %cst_50 = arith.constant 1.000000e+00 : f32
    %140 = vector.broadcast %cst_50 : f32 to vector<8x128xf32>
    %141 = arith.addf %140, %139 : vector<8x128xf32>
    %142 = arith.divf %140, %141 : vector<8x128xf32>
    %143 = arith.mulf %142, %16 : vector<8x128xf32>
    %144 = arith.addf %143, %19 : vector<8x128xf32>
    %c64_i32_51 = arith.constant 64 : i32
    %145 = tpu.dynamic_rotate %144 by %c64_i32_51 dim 1 : vector<8x128xf32>, i32 -> vector<8x128xf32>
    %c32_i32_52 = arith.constant 32 : i32
    %146 = tpu.dynamic_rotate %144 by %c32_i32_52 dim 1 : vector<8x128xf32>, i32 -> vector<8x128xf32>
    %c96_i32_53 = arith.constant 96 : i32
    %147 = tpu.dynamic_rotate %144 by %c96_i32_53 dim 1 : vector<8x128xf32>, i32 -> vector<8x128xf32>
    %148 = arith.mulf %146, %147 : vector<8x128xf32>
    %149 = arith.mulf %144, %128 : vector<8x128xf32>
    %150 = arith.addf %149, %148 : vector<8x128xf32>
    %151 = math.tanh %150 : vector<8x128xf32>
    %152 = arith.mulf %145, %151 : vector<8x128xf32>
    %c6_i32 = arith.constant 6 : i32
    %c8_i32_54 = arith.constant 8 : i32
    %153 = arith.muli %c6_i32, %c8_i32_54 : i32
    %154 = tpu.assume_multiple %153, 8 : i32
    %155 = arith.index_cast %154 : i32 to index
    %c0_55 = arith.constant 0 : index
    %156 = vector.load %arg7[%155, %c0_55] : memref<64x128xf32, #tpu.memory_space<vmem>>, vector<8x128xf32>
    %157 = arith.truncf %152 : vector<8x128xf32> to vector<8x128xbf16>
    %cst_56 = arith.constant dense<0.000000e+00> : vector<8x128xf32>
    %158 = tpu.matmul %157, %7, %cst_56 {dimension_numbers = #tpu.dot_dimension_numbers<[1], [0], [0], [1], [0, 0, 1, 1], [], []>} : vector<8x128xbf16>, vector<128x128xbf16>, vector<8x128xf32> -> vector<8x128xf32>
    %159 = arith.addf %156, %158 : vector<8x128xf32>
    %160 = arith.negf %159 : vector<8x128xf32>
    %161 = math.exp %160 : vector<8x128xf32>
    %cst_57 = arith.constant 1.000000e+00 : f32
    %162 = vector.broadcast %cst_57 : f32 to vector<8x128xf32>
    %163 = arith.addf %162, %161 : vector<8x128xf32>
    %164 = arith.divf %162, %163 : vector<8x128xf32>
    %165 = arith.mulf %164, %16 : vector<8x128xf32>
    %166 = arith.addf %165, %19 : vector<8x128xf32>
    %c64_i32_58 = arith.constant 64 : i32
    %167 = tpu.dynamic_rotate %166 by %c64_i32_58 dim 1 : vector<8x128xf32>, i32 -> vector<8x128xf32>
    %c32_i32_59 = arith.constant 32 : i32
    %168 = tpu.dynamic_rotate %166 by %c32_i32_59 dim 1 : vector<8x128xf32>, i32 -> vector<8x128xf32>
    %c96_i32_60 = arith.constant 96 : i32
    %169 = tpu.dynamic_rotate %166 by %c96_i32_60 dim 1 : vector<8x128xf32>, i32 -> vector<8x128xf32>
    %170 = arith.mulf %168, %169 : vector<8x128xf32>
    %171 = arith.mulf %166, %150 : vector<8x128xf32>
    %172 = arith.addf %171, %170 : vector<8x128xf32>
    %173 = math.tanh %172 : vector<8x128xf32>
    %174 = arith.mulf %167, %173 : vector<8x128xf32>
    %c7_i32 = arith.constant 7 : i32
    %c8_i32_61 = arith.constant 8 : i32
    %175 = arith.muli %c7_i32, %c8_i32_61 : i32
    %176 = tpu.assume_multiple %175, 8 : i32
    %177 = arith.index_cast %176 : i32 to index
    %c0_62 = arith.constant 0 : index
    %178 = vector.load %arg7[%177, %c0_62] : memref<64x128xf32, #tpu.memory_space<vmem>>, vector<8x128xf32>
    %179 = arith.truncf %174 : vector<8x128xf32> to vector<8x128xbf16>
    %cst_63 = arith.constant dense<0.000000e+00> : vector<8x128xf32>
    %180 = tpu.matmul %179, %7, %cst_63 {dimension_numbers = #tpu.dot_dimension_numbers<[1], [0], [0], [1], [0, 0, 1, 1], [], []>} : vector<8x128xbf16>, vector<128x128xbf16>, vector<8x128xf32> -> vector<8x128xf32>
    %181 = arith.addf %178, %180 : vector<8x128xf32>
    %182 = arith.negf %181 : vector<8x128xf32>
    %183 = math.exp %182 : vector<8x128xf32>
    %cst_64 = arith.constant 1.000000e+00 : f32
    %184 = vector.broadcast %cst_64 : f32 to vector<8x128xf32>
    %185 = arith.addf %184, %183 : vector<8x128xf32>
    %186 = arith.divf %184, %185 : vector<8x128xf32>
    %187 = arith.mulf %186, %16 : vector<8x128xf32>
    %188 = arith.addf %187, %19 : vector<8x128xf32>
    %c64_i32_65 = arith.constant 64 : i32
    %189 = tpu.dynamic_rotate %188 by %c64_i32_65 dim 1 : vector<8x128xf32>, i32 -> vector<8x128xf32>
    %c32_i32_66 = arith.constant 32 : i32
    %190 = tpu.dynamic_rotate %188 by %c32_i32_66 dim 1 : vector<8x128xf32>, i32 -> vector<8x128xf32>
    %c96_i32_67 = arith.constant 96 : i32
    %191 = tpu.dynamic_rotate %188 by %c96_i32_67 dim 1 : vector<8x128xf32>, i32 -> vector<8x128xf32>
    %192 = arith.mulf %190, %191 : vector<8x128xf32>
    %193 = arith.mulf %188, %172 : vector<8x128xf32>
    %194 = arith.addf %193, %192 : vector<8x128xf32>
    %195 = math.tanh %194 : vector<8x128xf32>
    %196 = arith.mulf %189, %195 : vector<8x128xf32>
    %c8_i32_68 = arith.constant 8 : i32
    %197 = arith.truncf %196 : vector<8x128xf32> to vector<8x128xbf16>
    %c0_69 = arith.constant 0 : index
    %c0_70 = arith.constant 0 : index
    %198 = vector.load %arg4[%c0_69, %c0_70] : memref<128x128xbf16, #tpu.memory_space<vmem>>, vector<128x128xbf16>
    %cst_71 = arith.constant dense<0.000000e+00> : vector<8x128xf32>
    %199 = tpu.matmul %197, %198, %cst_71 {dimension_numbers = #tpu.dot_dimension_numbers<[1], [0], [0], [1], [0, 0, 1, 1], [], []>} : vector<8x128xbf16>, vector<128x128xbf16>, vector<8x128xf32> -> vector<8x128xf32>
    %c0_72 = arith.constant 0 : index
    %c0_73 = arith.constant 0 : index
    %200 = vector.load %arg5[%c0_72, %c0_73] : memref<1x128xf32, #tpu.memory_space<vmem>>, vector<1x128xf32>
    %201 = vector.broadcast %200 : vector<1x128xf32> to vector<8x128xf32>
    %202 = arith.addf %199, %201 : vector<8x128xf32>
    %cst_74 = arith.constant dense<0xFF800000> : vector<8xf32>
    %203 = vector.multi_reduction <maximumf>, %202, %cst_74 [1] : vector<8x128xf32> to vector<8xf32>
    %204 = vector.shape_cast %203 : vector<8xf32> to vector<8x1xf32>
    %205 = vector.broadcast %204 : vector<8x1xf32> to vector<8x128xf32>
    %206 = arith.subf %202, %205 : vector<8x128xf32>
    %207 = math.exp %206 : vector<8x128xf32>
    %cst_75 = arith.constant dense<0.000000e+00> : vector<8xf32>
    %208 = vector.multi_reduction <add>, %207, %cst_75 [1] : vector<8x128xf32> to vector<8xf32>
    %209 = vector.shape_cast %208 : vector<8xf32> to vector<8x1xf32>
    %210 = tpu.reciprocal %209 {approx = true} : vector<8x1xf32> -> vector<8x1xf32>
    %211 = vector.broadcast %210 : vector<8x1xf32> to vector<8x128xf32>
    %212 = arith.mulf %207, %211 : vector<8x128xf32>
    %c0_76 = arith.constant 0 : index
    %c0_77 = arith.constant 0 : index
    %213 = vector.load %arg6[%c0_76, %c0_77] : memref<8x128xf32, #tpu.memory_space<vmem>>, vector<8x128xf32>
    tpu.vector_store %arg6[%c0_76, %c0_77], %212 {strides = array<i32>} : memref<8x128xf32, #tpu.memory_space<vmem>>, vector<8x128xf32>,
    return
  }
}

</mosaic_0001>

<bundles_post_ra>
// kernel: tpu_custom_call.1
= control target key start
LH: loop header
LB: loop body
LE: loop exit
PB: predicated region body
PF: predicated region fallthrough
CT: control target
= control target key end

     0   :  { %11 = vsyncpa [#allocation4], 0  ;;  %s1274_s0 = inlined_call_operand.hbm [shape: bf16[64,64], index: 0, kind: input, shape index: {}]   ;;  %s1275_s1 = inlined_call_operand.hbm [shape: bf16[64,128], index: 1, kind: input, shape index: {}]   ;;  %s1276_s2 = inlined_call_operand.hbm [shape: bf16[128,128], index: 2, kind: input, shape index: {}]   ;;  %s1277_s3 = inlined_call_operand.vmem [shape: f32[1,128], index: 3, kind: input, shape index: {}]   ;;  %s1278_s4 = inlined_call_operand.hbm [shape: bf16[128,128], index: 4, kind: input, shape index: {}]   ;;  %s1279_s5 = inlined_call_operand.vmem [shape: f32[1,128], index: 5, kind: input, shape index: {}]   ;;  %s1280_s6 = inlined_call_operand.hbm [shape: f32[8,128], index: 6, kind: output, shape index: {}]  }
   0x1   :  { %12 = vsyncpa [#allocation7], 0 }
   0x2   :  { %13 = vsyncpa [#allocation10], 0 }
   0x3   :  { %14 = vsyncpa [#allocation5], 0  ;;  %s32_s23 = sshll.u32 %s1275_s1, 4  ;;  %s1100_s24 = smov [#allocation6]   ;;  %s33_s23 = int_to_ptr.hbm [resolvable:$true] %s32_s23 }
   0x4   :  { %s34_s25 = sshll.u32 %s1100_s24, 4  ;;  %s19_s28 = sshll.u32 %s1274_s0, 4  ;;  %s35_s25 = int_to_ptr.vmem [resolvable:$true] %s34_s25  ;;  %s20_s28 = int_to_ptr.hbm [resolvable:$true] %s19_s28 }
   0x5   :  { %s1101_s29 = smov 64   ;;  %s1102_s30 = smov 4  }
   0x6   :  { %40 = dma.hbm_to_vmem [thread:$0]  %s33_s23, 512, %s35_s25, [#allocation7], %s1101_s29, %s1101_s29, %s1102_s30  }
   0x7   :  { %s1103_s7 = smov [#allocation3]   ;;  %s45_s1 = sshll.u32 %s1276_s2, 4  ;;  %s46_s1 = int_to_ptr.hbm [resolvable:$true] %s45_s1 }
   0x8   :  { %s21_s8 = sshll.u32 %s1103_s7, 4  ;;  %s60_s0 = sshll.u32 %s1278_s4, 4  ;;  %s22_s8 = int_to_ptr.vmem [resolvable:$true] %s21_s8  ;;  %s61_s0 = int_to_ptr.hbm [resolvable:$true] %s60_s0 }
   0x9   :  { %27 = dma.hbm_to_vmem [thread:$0]  %s20_s28, 512, %s22_s8, [#allocation4], %s1101_s29, %s1101_s29, %s1102_s30  }
   0xa   :  { %s1104_s13 = smov [#allocation8]   ;;  %s1105_s15 = smov [#allocation9]  }
   0xb   :  { %s47_s14 = sshll.u32 %s1104_s13, 4  ;;  %s62_s16 = sshll.u32 %s1105_s15, 4  ;;  %s48_s14 = int_to_ptr.vmem [resolvable:$true] %s47_s14  ;;  %s63_s16 = int_to_ptr.vmem [resolvable:$true] %s62_s16 }
   0xc   :  { %53 = dma.hbm_to_vmem [thread:$0]  %s46_s1, 1024, %s48_s14, [#allocation7], %s1101_s29, %s1101_s29, %s1102_s30  }
   0xd   :  { %68 = dma.hbm_to_vmem [thread:$0]  %s61_s0, 1024, %s63_s16, [#allocation10], %s1101_s29, %s1101_s29, %s1102_s30  }
   0xe   :  { %1092 = dma.done.wait [#allocation4], 512  }
   0xf   :  { %1093 = vsyncadd [#allocation4], 4294966784 }
  0x10   :  { %1094 = dma.done.wait [#allocation7], 1536  }
  0x11   :  { %1095 = vsyncadd [#allocation7], 4294965760 }
  0x12   :  { %1096 = dma.done.wait [#allocation10], 1024  }
  0x13   :  { %1097 = vsyncadd [#allocation10], 4294966272  ;;  %v1167_v0 = vld [vmem:[#allocation8 + $0x38] sm:$0xff]  ;;  %v1170_v2 = vld [vmem:[#allocation8 + $0x30] sm:$0xff]  ;;  %vm152_vm0 = vcmask 523264   ;;  %v1106_v13 = vmov 0   ;;  %v218_v23 = vlaneseq }
  0x14   :  { %v889_v1 = vld [vmem:[#allocation6 + $0x18] sm:$0xff]  ;;  %274 = vmatpush.bf16.msra.mxu1 %v1167_v0  ;;  %v888_v3 = vld [vmem:[#allocation6 + $0x10] sm:$0xff]  ;;  %323 = vmatpush.bf16.msra.mxu2 %v1167_v0  ;;  %v1175_v4 = vld [vmem:[#allocation8 + $0x28] sm:$0xff]  ;;  %v1107_v32 = vmov 1.0   ;;  %v1108_v36 = vmov 0.0   ;;  %s1110_s17 = smov 96  }
  0x15   :  { %169 = vmatpush.bf16.msra.mxu0 %v889_v1  ;;  %372 = vmatpush.bf16.msra.mxu3 %v1167_v0  ;;  %v887_v5 = vld [vmem:[#allocation6 + $0x8] sm:$0xff]  ;;  %v1180_v6 = vld [vmem:[#allocation8 + $0x20] sm:$0xff]  ;;  %v893_v9 = vld [vmem:[#allocation8 + $0x18] sm:$0xff]  ;;  %v219_v24 = vand.u32 127, %v218_v23  ;;  %s1111_s20 = smov [#allocation11]   ;;  %s762_s24 = sshll.u32 %s1280_s6, 4  ;;  %s763_s24 = int_to_ptr.hbm [resolvable:$true] %s762_s24 }
  0x16   :  { %v886_v7 = vld [vmem:[#allocation6] sm:$0xff]  ;;  %v892_v10 = vld [vmem:[#allocation8 + $0x10] sm:$0xff]  ;;  %v891_v11 = vld [vmem:[#allocation8 + $0x8] sm:$0xff]  ;;  %s760_s21 = sshll.u32 %s1111_s20, 4  ;;  %s761_s21 = int_to_ptr.vmem [resolvable:$true] %s760_s21 }
  0x17   :  { %v882_v8 = vld [vmem:[#allocation3] sm:$0xff]  ;;  %vm220_vm1 = vcmp.ge.s32.totalorder %v219_v24, 64  ;;  %vm221_vm2 = vcmp.lt.s32.totalorder %v219_v24, 96 }
  0x18   :  { %275 = vmatpush.bf16.msra.mxu1 %v1170_v2  ;;  %324 = vmatpush.bf16.msra.mxu2 %v1170_v2  ;;  %v890_v12 = vld [vmem:[#allocation8] sm:$0xff]  ;;  %vm222_vm3 = vmand %vm220_vm1, %vm221_vm2 }
  0x19   :  { %170 = vmatpush.bf16.msra.mxu0 %v888_v3  ;;  %373 = vmatpush.bf16.msra.mxu3 %v1170_v2  ;;  %v1211_v14 = vld [vmem:[%s1277_s3] ss:$0 sm:$0xff]  ;;  %v1214_v33 = vsel %vm222_vm3, 2.0, %v1107_v32  ;;  %v1216_v37 = vsel %vm222_vm3, -1.0, %v1108_v36  ;;  %s1109_s3 = smov 32  }
  0x1c   :  { %276 = vmatpush.bf16.msra.mxu1 %v1175_v4  ;;  %325 = vmatpush.bf16.msra.mxu2 %v1175_v4 }
  0x1d   :  { %171 = vmatpush.bf16.msra.mxu0 %v887_v5  ;;  %374 = vmatpush.bf16.msra.mxu3 %v1175_v4 }
  0x20   :  { %277 = vmatpush.bf16.msra.mxu1 %v1180_v6  ;;  %326 = vmatpush.bf16.msra.mxu2 %v1180_v6 }
  0x21   :  { %172 = vmatpush.bf16.msra.mxu0 %v886_v7  ;;  %375 = vmatpush.bf16.msra.mxu3 %v1180_v6 }
  0x24   :  { %806 = vmatmul.msk.bf16.vlgmr.msra.gmra.mxu0 %vm152_vm0, %v882_v8  ;;  %278 = vmatpush.bf16.msra.mxu1 %v893_v9 }
  0x25   :  { %568 = vmatpush.bf16.msrb.mxu0 %v1167_v0  ;;  %327 = vmatpush.bf16.msra.mxu2 %v893_v9 }
  0x26   :  { %376 = vmatpush.bf16.msra.mxu3 %v893_v9 }
  0x28   :  { %279 = vmatpush.bf16.msra.mxu1 %v892_v10 }
  0x29   :  { %569 = vmatpush.bf16.msrb.mxu0 %v1170_v2  ;;  %328 = vmatpush.bf16.msra.mxu2 %v892_v10 }
  0x2a   :  { %377 = vmatpush.bf16.msra.mxu3 %v892_v10 }
  0x2c   :  { %280 = vmatpush.bf16.msra.mxu1 %v891_v11 }
  0x2d   :  { %570 = vmatpush.bf16.msrb.mxu0 %v1175_v4  ;;  %329 = vmatpush.bf16.msra.mxu2 %v891_v11 }
  0x2e   :  { %378 = vmatpush.bf16.msra.mxu3 %v891_v11 }
  0x30   :  { %281 = vmatpush.bf16.msra.mxu1 %v890_v12 }
  0x31   :  { %571 = vmatpush.bf16.msrb.mxu0 %v1180_v6  ;;  %330 = vmatpush.bf16.msra.mxu2 %v890_v12 }
  0x32   :  { %379 = vmatpush.bf16.msra.mxu3 %v890_v12 }
  0x33   :  { %282 = vmatmul.bf16.vlgmr.msra.gmra.mxu1 %v1106_v13 }
  0x34   :  { %421 = vmatpush.bf16.msrb.mxu1 %v1167_v0 }
  0x35   :  { %470 = vmatpush.bf16.msrb.mxu2 %v1167_v0  ;;  %572 = vmatpush.bf16.msrb.mxu0 %v893_v9 }
  0x36   :  { %519 = vmatpush.bf16.msrb.mxu3 %v1167_v0 }
  0x38   :  { %422 = vmatpush.bf16.msrb.mxu1 %v1170_v2 }
  0x39   :  { %471 = vmatpush.bf16.msrb.mxu2 %v1170_v2  ;;  %573 = vmatpush.bf16.msrb.mxu0 %v892_v10 }
  0x3a   :  { %520 = vmatpush.bf16.msrb.mxu3 %v1170_v2 }
  0x3c   :  { %423 = vmatpush.bf16.msrb.mxu1 %v1175_v4 }
  0x3d   :  { %472 = vmatpush.bf16.msrb.mxu2 %v1175_v4  ;;  %574 = vmatpush.bf16.msrb.mxu0 %v891_v11 }
  0x3e   :  { %521 = vmatpush.bf16.msrb.mxu3 %v1175_v4 }
  0x40   :  { %424 = vmatpush.bf16.msrb.mxu1 %v1180_v6 }
  0x41   :  { %473 = vmatpush.bf16.msrb.mxu2 %v1180_v6  ;;  %575 = vmatpush.bf16.msrb.mxu0 %v890_v12 }
  0x42   :  { %522 = vmatpush.bf16.msrb.mxu3 %v1180_v6 }
  0x44   :  { %425 = vmatpush.bf16.msrb.mxu1 %v893_v9 }
  0x45   :  { %474 = vmatpush.bf16.msrb.mxu2 %v893_v9 }
  0x46   :  { %523 = vmatpush.bf16.msrb.mxu3 %v893_v9 }
  0x48   :  { %426 = vmatpush.bf16.msrb.mxu1 %v892_v10 }
  0x49   :  { %475 = vmatpush.bf16.msrb.mxu2 %v892_v10 }
  0x4a   :  { %524 = vmatpush.bf16.msrb.mxu3 %v892_v10 }
  0x4c   :  { %427 = vmatpush.bf16.msrb.mxu1 %v891_v11 }
  0x4d   :  { %476 = vmatpush.bf16.msrb.mxu2 %v891_v11 }
  0x4e   :  { %525 = vmatpush.bf16.msrb.mxu3 %v891_v11 }
  0x50   :  { %428 = vmatpush.bf16.msrb.mxu1 %v890_v12 }
  0x51   :  { %477 = vmatpush.bf16.msrb.mxu2 %v890_v12 }
  0x52   :  { %526 = vmatpush.bf16.msrb.mxu3 %v890_v12 }
  0x54   :  { %617 = vmatpush.bf16.msra.mxu1 %v1167_v0 }
  0x58   :  { %618 = vmatpush.bf16.msra.mxu1 %v1170_v2 }
  0x5c   :  { %619 = vmatpush.bf16.msra.mxu1 %v1175_v4 }
  0x60   :  { %620 = vmatpush.bf16.msra.mxu1 %v1180_v6  ;;  %v883_v6 = vld [vmem:[#allocation3 + $0x8] sm:$0xff] }
  0x61   :  { %807 = vmatmul.msk.bf16.gmra.mxu0 %vm152_vm0, %v883_v6 }
  0x64   :  { %621 = vmatpush.bf16.msra.mxu1 %v893_v9 }
  0x68   :  { %622 = vmatpush.bf16.msra.mxu1 %v892_v10 }
  0x6c   :  { %623 = vmatpush.bf16.msra.mxu1 %v891_v11 }
  0x70   :  { %624 = vmatpush.bf16.msra.mxu1 %v890_v12 }
  0xa1   :  { %v174_v15 = vpop.f32.mrf.mxu0 }
  0xa2   :  { %v175_v16 = vadd.f32 %v1211_v14, %v174_v15 }
  0xa9   :  { %v176_v50 = vpop.f32.mrf.mxu0 }
  0xaa   :  { %v177_v51 = vadd.f32 %v1211_v14, %v176_v50 }
  0xb0   :  { %v283_v17 = vpop.f32.mrf.mxu1 }
  0xb1   :  { %v287_v18 = vadd.f32 %v283_v17, %v175_v16 }
  0xb3   :  { %v842_v19 = vmul.f32 -1.442695, %v287_v18 }
  0xb5   :  { %920 = vpow2.f32 %v842_v19 }
  0xb8   :  { %v285_v20 = vpop.f32.mrf.mxu1 }
  0xbb   :  { %v921_v21 = vpop.eup %920 }
  0xbc   :  { %v291_v22 = vadd.f32 1.0, %v921_v21 }
  0xbe   :  { %922 = vrcp.f32 %v291_v22  ;;  %v303_v28 = vand.u32 2147483648, %v291_v22  ;;  %v301_v30 = vand.u32 2147483647, %v291_v22  ;;  %vm297_vm5 = vweird.f32 %v291_v22 }
  0xc0   :  { %v304_v34 = vor.u32 1.1754944e-38, %v303_v28  ;;  %vm302_vm7 = vcmp.eq.f32.partialorder %v301_v30, 8.507059e+37 }
  0xc4   :  { %v923_v25 = vpop.eup %922 }
  0xc5   :  { %v293_v26 = vmul.f32 %v923_v25, %v291_v22  ;;  %vm298_vm4 = vweird.f32 %v923_v25 }
  0xc6   :  { %vm299_vm6 = vmor %vm297_vm5, %vm298_vm4 }
  0xc7   :  { %v294_v27 = vsub.f32 1.0, %v293_v26 }
  0xc9   :  { %v295_v29 = vmul.f32 %v923_v25, %v294_v27 }
  0xcb   :  { %v296_v31 = vadd.f32 %v923_v25, %v295_v29 }
  0xcd   :  { %v300_v35 = vsel %vm299_vm6, %v923_v25, %v296_v31 }
  0xce   :  { %v305_v38 = vsel %vm302_vm7, %v304_v34, %v300_v35 }
  0xcf   :  { %v307_v39 = vmul.f32 %v305_v38, %v1214_v33 }
  0xd1   :  { %v308_v40 = vadd.f32 %v307_v39, %v1216_v37 }
  0xd3   :  { %309 = vrot.lane.b32.xlu1 %v308_v40, %s1101_s29  ;;  %311 = vrot.lane.b32.xlu0 %v308_v40, %s1109_s3  ;;  %v316_v44 = vmul.f32 0.0, %v308_v40 }
  0xdb   :  { %313 = vrot.lane.b32.xlu0 %v308_v40, %s1110_s17 }
  0xde   :  { %v179_v17 = vpop.f32.mrf.mxu0 }
  0xdf   :  { %v180_v18 = vadd.f32 %v1211_v14, %v179_v17 }
 0x145   :  { %v312_v41 = vpop.permute.xlu0 %311  ;;  %v310_v47 = vpop.permute.xlu1 %309 }
 0x14d   :  { %v314_v42 = vpop.permute.xlu0 %313 }
 0x14e   :  { %v315_v43 = vmul.f32 %v314_v42, %v312_v41 }
 0x150   :  { %v317_v45 = vadd.f32 %v316_v44, %v315_v43 }
 0x152   :  { %924 = vtanh.f32 %v317_v45 }
 0x158   :  { %v925_v46 = vpop.eup %924 }
 0x159   :  { %v319_v48 = vmul.f32 %v925_v46, %v310_v47 }
 0x15b   :  { %v322_v49 = vpack.c.bf16 %v319_v48, %v319_v48  ;;  %v181_v48 = vpop.f32.mrf.mxu0 }
 0x15d   :  { %331 = vmatmul.bf16.vlgmr.msra.gmra.mxu2 %v322_v49  ;;  %v182_v49 = vadd.f32 %v1211_v14, %v181_v48 }
 0x1e0   :  { %v332_v52 = vpop.f32.mrf.mxu2 }
 0x1e1   :  { %v336_v53 = vadd.f32 %v332_v52, %v177_v51 }
 0x1e3   :  { %v843_v54 = vmul.f32 -1.442695, %v336_v53 }
 0x1e5   :  { %926 = vpow2.f32 %v843_v54 }
 0x1e8   :  { %v334_v55 = vpop.f32.mrf.mxu2 }
 0x1eb   :  { %v927_v56 = vpop.eup %926 }
 0x1ec   :  { %v340_v57 = vadd.f32 1.0, %v927_v56 }
 0x1ee   :  { %928 = vrcp.f32 %v340_v57  ;;  %v352_v61 = vand.u32 2147483648, %v340_v57  ;;  %v350_v63 = vand.u32 2147483647, %v340_v57  ;;  %vm346_vm9 = vweird.f32 %v340_v57 }
 0x1f0   :  { %v353_v1 = vor.u32 1.1754944e-38, %v352_v61  ;;  %vm351_vm11 = vcmp.eq.f32.partialorder %v350_v63, 8.507059e+37 }
 0x1f4   :  { %v929_v58 = vpop.eup %928 }
 0x1f5   :  { %v342_v59 = vmul.f32 %v929_v58, %v340_v57  ;;  %vm347_vm8 = vweird.f32 %v929_v58 }
 0x1f6   :  { %vm348_vm10 = vmor %vm346_vm9, %vm347_vm8 }
 0x1f7   :  { %v343_v60 = vsub.f32 1.0, %v342_v59 }
 0x1f9   :  { %v344_v62 = vmul.f32 %v929_v58, %v343_v60 }
 0x1fb   :  { %v345_v0 = vadd.f32 %v929_v58, %v344_v62 }
 0x1fd   :  { %v349_v2 = vsel %vm348_vm10, %v929_v58, %v345_v0 }
 0x1fe   :  { %v354_v3 = vsel %vm351_vm11, %v353_v1, %v349_v2 }
 0x1ff   :  { %v356_v4 = vmul.f32 %v354_v3, %v1214_v33 }
 0x201   :  { %v357_v5 = vadd.f32 %v356_v4, %v1216_v37  ;;  %v884_v4 = vld [vmem:[#allocation3 + $0x10] sm:$0xff] }
 0x202   :  { %808 = vmatmul.msk.bf16.gmra.mxu0 %vm152_vm0, %v884_v4 }
 0x203   :  { %362 = vrot.lane.b32.xlu2 %v357_v5, %s1110_s17  ;;  %360 = vrot.lane.b32.xlu1 %v357_v5, %s1109_s3  ;;  %v365_v10 = vmul.f32 %v357_v5, %v317_v45 }
 0x20b   :  { %358 = vrot.lane.b32.xlu2 %v357_v5, %s1101_s29 }
 0x25d   :  { %v363_v7 = vpop.permute.xlu2 %362 }
 0x265   :  { %v359_v13 = vpop.permute.xlu2 %358 }
 0x275   :  { %v361_v8 = vpop.permute.xlu1 %360 }
 0x276   :  { %v364_v9 = vmul.f32 %v363_v7, %v361_v8 }
 0x278   :  { %v366_v11 = vadd.f32 %v365_v10, %v364_v9 }
 0x27a   :  { %930 = vtanh.f32 %v366_v11 }
 0x280   :  { %v931_v12 = vpop.eup %930 }
 0x281   :  { %v368_v15 = vmul.f32 %v931_v12, %v359_v13 }
 0x283   :  { %v371_v16 = vpack.c.bf16 %v368_v15, %v368_v15  ;;  %v184_v15 = vpop.f32.mrf.mxu0 }
 0x285   :  { %380 = vmatmul.bf16.vlgmr.msra.gmra.mxu3 %v371_v16  ;;  %v185_v16 = vadd.f32 %v1211_v14, %v184_v15 }
 0x308   :  { %v381_v19 = vpop.f32.mrf.mxu3 }
 0x309   :  { %v385_v20 = vadd.f32 %v381_v19, %v180_v18 }
 0x30b   :  { %v844_v21 = vmul.f32 -1.442695, %v385_v20 }
 0x30d   :  { %932 = vpow2.f32 %v844_v21 }
 0x310   :  { %v383_v22 = vpop.f32.mrf.mxu3 }
 0x313   :  { %v933_v23 = vpop.eup %932 }
 0x314   :  { %v389_v24 = vadd.f32 1.0, %v933_v23 }
 0x316   :  { %934 = vrcp.f32 %v389_v24  ;;  %v401_v28 = vand.u32 2147483648, %v389_v24  ;;  %v399_v30 = vand.u32 2147483647, %v389_v24  ;;  %vm395_vm13 = vweird.f32 %v389_v24 }
 0x318   :  { %v402_v32 = vor.u32 1.1754944e-38, %v401_v28  ;;  %vm400_vm15 = vcmp.eq.f32.partialorder %v399_v30, 8.507059e+37 }
 0x31c   :  { %v935_v25 = vpop.eup %934 }
 0x31d   :  { %v391_v26 = vmul.f32 %v935_v25, %v389_v24  ;;  %vm396_vm12 = vweird.f32 %v935_v25 }
 0x31e   :  { %vm397_vm14 = vmor %vm395_vm13, %vm396_vm12 }
 0x31f   :  { %v392_v27 = vsub.f32 1.0, %v391_v26 }
 0x321   :  { %v393_v29 = vmul.f32 %v935_v25, %v392_v27 }
 0x323   :  { %v394_v31 = vadd.f32 %v935_v25, %v393_v29 }
 0x325   :  { %v398_v34 = vsel %vm397_vm14, %v935_v25, %v394_v31 }
 0x326   :  { %v403_v35 = vsel %vm400_vm15, %v402_v32, %v398_v34 }
 0x327   :  { %v405_v36 = vmul.f32 %v403_v35, %v1214_v33 }
 0x329   :  { %v406_v38 = vadd.f32 %v405_v36, %v1216_v37 }
 0x32b   :  { %407 = vrot.lane.b32.xlu2 %v406_v38, %s1101_s29  ;;  %411 = vrot.lane.b32.xlu1 %v406_v38, %s1110_s17  ;;  %v414_v42 = vmul.f32 %v406_v38, %v366_v11 }
 0x32c   :  { %409 = vrot.lane.b32.xlu0 %v406_v38, %s1109_s3 }
 0x385   :  { %v408_v45 = vpop.permute.xlu2 %407 }
 0x39d   :  { %v412_v39 = vpop.permute.xlu1 %411 }
 0x39e   :  { %v410_v40 = vpop.permute.xlu0 %409 }
 0x39f   :  { %v413_v41 = vmul.f32 %v412_v39, %v410_v40 }
 0x3a1   :  { %v415_v43 = vadd.f32 %v414_v42, %v413_v41 }
 0x3a3   :  { %936 = vtanh.f32 %v415_v43 }
 0x3a9   :  { %v937_v44 = vpop.eup %936 }
 0x3aa   :  { %v417_v46 = vmul.f32 %v937_v44, %v408_v45 }
 0x3ac   :  { %v420_v47 = vpack.c.bf16 %v417_v46, %v417_v46  ;;  %v186_v46 = vpop.f32.mrf.mxu0 }
 0x3ae   :  { %429 = vmatmul.bf16.vlgmr.msrb.gmra.mxu1 %v420_v47  ;;  %v187_v47 = vadd.f32 %v1211_v14, %v186_v46 }
 0x42b   :  { %v430_v50 = vpop.f32.mrf.mxu1 }
 0x42c   :  { %v434_v51 = vadd.f32 %v430_v50, %v182_v49 }
 0x42e   :  { %v845_v52 = vmul.f32 -1.442695, %v434_v51 }
 0x430   :  { %938 = vpow2.f32 %v845_v52 }
 0x433   :  { %v432_v53 = vpop.f32.mrf.mxu1 }
 0x436   :  { %v939_v54 = vpop.eup %938 }
 0x437   :  { %v438_v55 = vadd.f32 1.0, %v939_v54 }
 0x439   :  { %940 = vrcp.f32 %v438_v55  ;;  %v450_v59 = vand.u32 2147483648, %v438_v55  ;;  %v448_v61 = vand.u32 2147483647, %v438_v55  ;;  %vm444_vm2 = vweird.f32 %v438_v55 }
 0x43b   :  { %v451_v63 = vor.u32 1.1754944e-38, %v450_v59  ;;  %vm449_vm4 = vcmp.eq.f32.partialorder %v448_v61, 8.507059e+37 }
 0x43f   :  { %v941_v56 = vpop.eup %940 }
 0x440   :  { %v440_v57 = vmul.f32 %v941_v56, %v438_v55  ;;  %vm445_vm1 = vweird.f32 %v941_v56 }
 0x441   :  { %vm446_vm3 = vmor %vm444_vm2, %vm445_vm1 }
 0x442   :  { %v441_v58 = vsub.f32 1.0, %v440_v57 }
 0x444   :  { %v442_v60 = vmul.f32 %v941_v56, %v441_v58 }
 0x446   :  { %v443_v62 = vadd.f32 %v941_v56, %v442_v60 }
 0x448   :  { %v447_v0 = vsel %vm446_vm3, %v941_v56, %v443_v62 }
 0x449   :  { %v452_v1 = vsel %vm449_vm4, %v451_v63, %v447_v0 }
 0x44a   :  { %v454_v2 = vmul.f32 %v452_v1, %v1214_v33 }
 0x44c   :  { %v455_v3 = vadd.f32 %v454_v2, %v1216_v37  ;;  %v885_v2 = vld [vmem:[#allocation3 + $0x18] sm:$0xff] }
 0x44d   :  { %809 = vmatmul.msk.bf16.gmra.mxu0 %vm152_vm0, %v885_v2  ;;  %v902_v2 = vld [vmem:[#allocation9 + $0x20] sm:$0xff] }
 0x44e   :  { %456 = vrot.lane.b32.xlu2 %v455_v3, %s1101_s29  ;;  %460 = vrot.lane.b32.xlu1 %v455_v3, %s1110_s17  ;;  %v463_v8 = vmul.f32 %v455_v3, %v415_v43 }
 0x44f   :  { %458 = vrot.lane.b32.xlu0 %v455_v3, %s1109_s3 }
 0x4a8   :  { %v457_v11 = vpop.permute.xlu2 %456 }
 0x4c0   :  { %v461_v5 = vpop.permute.xlu1 %460 }
 0x4c1   :  { %v459_v6 = vpop.permute.xlu0 %458 }
 0x4c2   :  { %v462_v7 = vmul.f32 %v461_v5, %v459_v6 }
 0x4c4   :  { %v464_v9 = vadd.f32 %v463_v8, %v462_v7 }
 0x4c6   :  { %942 = vtanh.f32 %v464_v9 }
 0x4cc   :  { %v943_v10 = vpop.eup %942 }
 0x4cd   :  { %v466_v12 = vmul.f32 %v943_v10, %v457_v11 }
 0x4cf   :  { %v469_v13 = vpack.c.bf16 %v466_v12, %v466_v12  ;;  %v189_v12 = vpop.f32.mrf.mxu0 }
 0x4d0   :  { %v190_v15 = vadd.f32 %v1211_v14, %v189_v12 }
 0x4d1   :  { %478 = vmatmul.bf16.vlgmr.msrb.gmra.mxu2 %v469_v13 }
 0x4d7   :  { %v191_v13 = vpop.f32.mrf.mxu0 }
 0x554   :  { %v479_v17 = vpop.f32.mrf.mxu2 }
 0x555   :  { %v483_v18 = vadd.f32 %v479_v17, %v185_v16 }
 0x557   :  { %v846_v19 = vmul.f32 -1.442695, %v483_v18 }
 0x559   :  { %944 = vpow2.f32 %v846_v19 }
 0x55c   :  { %v481_v20 = vpop.f32.mrf.mxu2 }
 0x55f   :  { %v945_v21 = vpop.eup %944 }
 0x560   :  { %v487_v22 = vadd.f32 1.0, %v945_v21 }
 0x562   :  { %946 = vrcp.f32 %v487_v22  ;;  %v499_v26 = vand.u32 2147483648, %v487_v22  ;;  %v497_v28 = vand.u32 2147483647, %v487_v22  ;;  %vm493_vm6 = vweird.f32 %v487_v22 }
 0x564   :  { %v500_v30 = vor.u32 1.1754944e-38, %v499_v26  ;;  %vm498_vm8 = vcmp.eq.f32.partialorder %v497_v28, 8.507059e+37 }
 0x568   :  { %v947_v23 = vpop.eup %946 }
 0x569   :  { %v489_v24 = vmul.f32 %v947_v23, %v487_v22  ;;  %vm494_vm5 = vweird.f32 %v947_v23 }
 0x56a   :  { %vm495_vm7 = vmor %vm493_vm6, %vm494_vm5 }
 0x56b   :  { %v490_v25 = vsub.f32 1.0, %v489_v24 }
 0x56d   :  { %v491_v27 = vmul.f32 %v947_v23, %v490_v25 }
 0x56f   :  { %v492_v29 = vadd.f32 %v947_v23, %v491_v27 }
 0x571   :  { %v496_v31 = vsel %vm495_vm7, %v947_v23, %v492_v29 }
 0x572   :  { %v501_v32 = vsel %vm498_vm8, %v500_v30, %v496_v31 }
 0x573   :  { %v503_v34 = vmul.f32 %v501_v32, %v1214_v33 }
 0x575   :  { %v504_v35 = vadd.f32 %v503_v34, %v1216_v37 }
 0x577   :  { %505 = vrot.lane.b32.xlu2 %v504_v35, %s1101_s29  ;;  %509 = vrot.lane.b32.xlu1 %v504_v35, %s1110_s17  ;;  %v512_v40 = vmul.f32 %v504_v35, %v464_v9 }
 0x578   :  { %507 = vrot.lane.b32.xlu0 %v504_v35, %s1109_s3 }
 0x5d1   :  { %v506_v43 = vpop.permute.xlu2 %505 }
 0x5e9   :  { %v510_v36 = vpop.permute.xlu1 %509 }
 0x5ea   :  { %v508_v38 = vpop.permute.xlu0 %507 }
 0x5eb   :  { %v511_v39 = vmul.f32 %v510_v36, %v508_v38 }
 0x5ed   :  { %v513_v41 = vadd.f32 %v512_v40, %v511_v39 }
 0x5ef   :  { %948 = vtanh.f32 %v513_v41 }
 0x5f5   :  { %v949_v42 = vpop.eup %948 }
 0x5f6   :  { %v515_v44 = vmul.f32 %v949_v42, %v506_v43 }
 0x5f8   :  { %v518_v45 = vpack.c.bf16 %v515_v44, %v515_v44 }
 0x5fa   :  { %527 = vmatmul.bf16.vlgmr.msrb.gmra.mxu3 %v518_v45  ;;  %v192_v45 = vadd.f32 %v1211_v14, %v191_v13 }
 0x67d   :  { %v528_v48 = vpop.f32.mrf.mxu3 }
 0x67e   :  { %v532_v49 = vadd.f32 %v528_v48, %v187_v47 }
 0x680   :  { %v847_v50 = vmul.f32 -1.442695, %v532_v49 }
 0x682   :  { %950 = vpow2.f32 %v847_v50 }
 0x685   :  { %v530_v51 = vpop.f32.mrf.mxu3 }
 0x688   :  { %v951_v52 = vpop.eup %950 }
 0x689   :  { %v536_v53 = vadd.f32 1.0, %v951_v52 }
 0x68b   :  { %952 = vrcp.f32 %v536_v53  ;;  %v548_v57 = vand.u32 2147483648, %v536_v53  ;;  %v546_v59 = vand.u32 2147483647, %v536_v53  ;;  %vm542_vm10 = vweird.f32 %v536_v53 }
 0x68d   :  { %v549_v61 = vor.u32 1.1754944e-38, %v548_v57  ;;  %vm547_vm12 = vcmp.eq.f32.partialorder %v546_v59, 8.507059e+37 }
 0x691   :  { %v953_v54 = vpop.eup %952 }
 0x692   :  { %v538_v55 = vmul.f32 %v953_v54, %v536_v53  ;;  %vm543_vm9 = vweird.f32 %v953_v54 }
 0x693   :  { %vm544_vm11 = vmor %vm542_vm10, %vm543_vm9 }
 0x694   :  { %v539_v56 = vsub.f32 1.0, %v538_v55 }
 0x696   :  { %v540_v58 = vmul.f32 %v953_v54, %v539_v56 }
 0x698   :  { %v541_v60 = vadd.f32 %v953_v54, %v540_v58 }
 0x69a   :  { %v545_v62 = vsel %vm544_vm11, %v953_v54, %v541_v60 }
 0x69b   :  { %v550_v63 = vsel %vm547_vm12, %v549_v61, %v545_v62 }
 0x69c   :  { %v552_v0 = vmul.f32 %v550_v63, %v1214_v33  ;;  %v905_v63 = vld [vmem:[#allocation9 + $0x38] sm:$0xff] }
 0x69d   :  { %732 = vmatpush.bf16.msra.mxu2 %v905_v63 }
 0x69e   :  { %v553_v1 = vadd.f32 %v552_v0, %v1216_v37  ;;  %v904_v0 = vld [vmem:[#allocation9 + $0x30] sm:$0xff] }
 0x6a0   :  { %554 = vrot.lane.b32.xlu2 %v553_v1, %s1101_s29  ;;  %558 = vrot.lane.b32.xlu1 %v553_v1, %s1110_s17  ;;  %v561_v6 = vmul.f32 %v553_v1, %v513_v41 }
 0x6a1   :  { %556 = vrot.lane.b32.xlu0 %v553_v1, %s1109_s3  ;;  %733 = vmatpush.bf16.msra.mxu2 %v904_v0  ;;  %v903_v1 = vld [vmem:[#allocation9 + $0x28] sm:$0xff] }
 0x6a5   :  { %734 = vmatpush.bf16.msra.mxu2 %v903_v1 }
 0x6a9   :  { %735 = vmatpush.bf16.msra.mxu2 %v902_v2 }
 0x6fa   :  { %v555_v9 = vpop.permute.xlu2 %554 }
 0x712   :  { %v559_v3 = vpop.permute.xlu1 %558 }
 0x713   :  { %v557_v4 = vpop.permute.xlu0 %556 }
 0x714   :  { %v560_v5 = vmul.f32 %v559_v3, %v557_v4  ;;  %v901_v3 = vld [vmem:[#allocation9 + $0x18] sm:$0xff]  ;;  %v900_v4 = vld [vmem:[#allocation9 + $0x10] sm:$0xff] }
 0x715   :  { %736 = vmatpush.bf16.msra.mxu2 %v901_v3 }
 0x716   :  { %v562_v7 = vadd.f32 %v561_v6, %v560_v5 }
 0x718   :  { %954 = vtanh.f32 %v562_v7 }
 0x719   :  { %737 = vmatpush.bf16.msra.mxu2 %v900_v4 }
 0x71e   :  { %v955_v8 = vpop.eup %954 }
 0x71f   :  { %v564_v10 = vmul.f32 %v955_v8, %v555_v9 }
 0x721   :  { %v567_v11 = vpack.c.bf16 %v564_v10, %v564_v10 }
 0x723   :  { %576 = vmatmul.bf16.vlgmr.msrb.gmra.mxu0 %v567_v11 }
 0x7a0   :  { %v577_v16 = vpop.f32.mrf.mxu0 }
 0x7a1   :  { %v581_v17 = vadd.f32 %v577_v16, %v190_v15  ;;  %v919_v15 = vld [vmem:[%s1279_s5] ss:$0 sm:$0xff] }
 0x7a3   :  { %v848_v18 = vmul.f32 -1.442695, %v581_v17 }
 0x7a5   :  { %956 = vpow2.f32 %v848_v18 }
 0x7a8   :  { %v579_v19 = vpop.f32.mrf.mxu0 }
 0x7ab   :  { %v957_v20 = vpop.eup %956 }
 0x7ac   :  { %v585_v21 = vadd.f32 1.0, %v957_v20 }
 0x7ae   :  { %958 = vrcp.f32 %v585_v21  ;;  %v597_v25 = vand.u32 2147483648, %v585_v21  ;;  %v595_v27 = vand.u32 2147483647, %v585_v21  ;;  %vm591_vm13 = vweird.f32 %v585_v21 }
 0x7b0   :  { %v598_v29 = vor.u32 1.1754944e-38, %v597_v25  ;;  %vm596_vm15 = vcmp.eq.f32.partialorder %v595_v27, 8.507059e+37 }
 0x7b4   :  { %v959_v22 = vpop.eup %958 }
 0x7b5   :  { %v587_v23 = vmul.f32 %v959_v22, %v585_v21  ;;  %vm592_vm0 = vweird.f32 %v959_v22 }
 0x7b6   :  { %vm593_vm14 = vmor %vm591_vm13, %vm592_vm0 }
 0x7b7   :  { %v588_v24 = vsub.f32 1.0, %v587_v23 }
 0x7b9   :  { %v589_v26 = vmul.f32 %v959_v22, %v588_v24 }
 0x7bb   :  { %v590_v28 = vadd.f32 %v959_v22, %v589_v26 }
 0x7bd   :  { %v594_v30 = vsel %vm593_vm14, %v959_v22, %v590_v28 }
 0x7be   :  { %v599_v31 = vsel %vm596_vm15, %v598_v29, %v594_v30 }
 0x7bf   :  { %v601_v32 = vmul.f32 %v599_v31, %v1214_v33 }
 0x7c1   :  { %v602_v34 = vadd.f32 %v601_v32, %v1216_v37 }
 0x7c3   :  { %603 = vrot.lane.b32.xlu2 %v602_v34, %s1101_s29  ;;  %607 = vrot.lane.b32.xlu1 %v602_v34, %s1110_s17  ;;  %v610_v39 = vmul.f32 %v602_v34, %v562_v7 }
 0x7c4   :  { %605 = vrot.lane.b32.xlu0 %v602_v34, %s1109_s3 }
 0x81d   :  { %v604_v42 = vpop.permute.xlu2 %603 }
 0x835   :  { %v608_v35 = vpop.permute.xlu1 %607 }
 0x836   :  { %v606_v36 = vpop.permute.xlu0 %605 }
 0x837   :  { %v609_v38 = vmul.f32 %v608_v35, %v606_v36 }
 0x839   :  { %v611_v40 = vadd.f32 %v610_v39, %v609_v38 }
 0x83b   :  { %960 = vtanh.f32 %v611_v40 }
 0x841   :  { %v961_v41 = vpop.eup %960 }
 0x842   :  { %v613_v43 = vmul.f32 %v961_v41, %v604_v42 }
 0x844   :  { %v616_v44 = vpack.c.bf16 %v613_v43, %v613_v43 }
 0x846   :  { %625 = vmatmul.bf16.vlgmr.msra.gmra.mxu1 %v616_v44 }
 0x8c3   :  { %v626_v46 = vpop.f32.mrf.mxu1 }
 0x8c4   :  { %v630_v47 = vadd.f32 %v626_v46, %v192_v45 }
 0x8c6   :  { %v849_v48 = vmul.f32 -1.442695, %v630_v47 }
 0x8c8   :  { %962 = vpow2.f32 %v849_v48 }
 0x8cb   :  { %v628_v49 = vpop.f32.mrf.mxu1 }
 0x8ce   :  { %v963_v50 = vpop.eup %962 }
 0x8cf   :  { %v634_v51 = vadd.f32 1.0, %v963_v50 }
 0x8d1   :  { %964 = vrcp.f32 %v634_v51  ;;  %v646_v55 = vand.u32 2147483648, %v634_v51  ;;  %v644_v57 = vand.u32 2147483647, %v634_v51  ;;  %vm640_vm2 = vweird.f32 %v634_v51 }
 0x8d3   :  { %v647_v59 = vor.u32 1.1754944e-38, %v646_v55  ;;  %vm645_vm4 = vcmp.eq.f32.partialorder %v644_v57, 8.507059e+37 }
 0x8d7   :  { %v965_v52 = vpop.eup %964 }
 0x8d8   :  { %v636_v53 = vmul.f32 %v965_v52, %v634_v51  ;;  %vm641_vm1 = vweird.f32 %v965_v52 }
 0x8d9   :  { %vm642_vm3 = vmor %vm640_vm2, %vm641_vm1 }
 0x8da   :  { %v637_v54 = vsub.f32 1.0, %v636_v53 }
 0x8dc   :  { %v638_v56 = vmul.f32 %v965_v52, %v637_v54 }
 0x8de   :  { %v639_v58 = vadd.f32 %v965_v52, %v638_v56 }
 0x8e0   :  { %v643_v14 = vsel %vm642_vm3, %v965_v52, %v639_v58 }
 0x8e1   :  { %v648_v60 = vsel %vm645_vm4, %v647_v59, %v643_v14 }
 0x8e2   :  { %v650_v61 = vmul.f32 %v648_v60, %v1214_v33  ;;  %v899_v33 = vld [vmem:[#allocation9 + $0x8] sm:$0xff] }
 0x8e3   :  { %738 = vmatpush.bf16.msra.mxu2 %v899_v33 }
 0x8e4   :  { %v651_v62 = vadd.f32 %v650_v61, %v1216_v37  ;;  %v898_v37 = vld [vmem:[#allocation9] sm:$0xff] }
 0x8e6   :  { %652 = vrot.lane.b32.xlu2 %v651_v62, %s1101_s29  ;;  %656 = vrot.lane.b32.xlu1 %v651_v62, %s1110_s17  ;;  %v659_v8 = vmul.f32 %v651_v62, %v611_v40 }
 0x8e7   :  { %654 = vrot.lane.b32.xlu0 %v651_v62, %s1109_s3  ;;  %739 = vmatpush.bf16.msra.mxu2 %v898_v37 }
 0x940   :  { %v653_v11 = vpop.permute.xlu2 %652 }
 0x958   :  { %v657_v5 = vpop.permute.xlu1 %656 }
 0x959   :  { %v655_v6 = vpop.permute.xlu0 %654 }
 0x95a   :  { %v658_v7 = vmul.f32 %v657_v5, %v655_v6 }
 0x95c   :  { %v660_v9 = vadd.f32 %v659_v8, %v658_v7 }
 0x95e   :  { %966 = vtanh.f32 %v660_v9 }
 0x964   :  { %v967_v10 = vpop.eup %966 }
 0x965   :  { %v662_v12 = vmul.f32 %v967_v10, %v653_v11 }
 0x967   :  { %v663_v13 = vpack.c.bf16 %v662_v12, %v662_v12 }
 0x969   :  { %740 = vmatmul.bf16.vlgmr.msra.gmra.mxu2 %v663_v13 }
 0x9ec   :  { %v741_v16 = vpop.f32.mrf.mxu2 }
 0x9ed   :  { %v742_v17 = vadd.f32 %v919_v15, %v741_v16 }
 0x9ef   :  { %745 = vmax.xlane.f32.xlu0 %v742_v17 }
 0x9f4   :  { %v743_v18 = vpop.f32.mrf.mxu2 }
 0xa62   :  { %v746_v19 = vpop.xlane.xlu0 %745 }
 0xa63   :  { %v747_v20 = vsub.f32 %v742_v17, %v746_v19 }
 0xa65   :  { %v748_v21 = vmul.f32 1.442695, %v747_v20 }
 0xa67   :  { %968 = vpow2.f32 %v748_v21 }
 0xa6d   :  { %v969_v22 = vpop.eup %968 }
 0xa6e   :  { %750 = vadd.xlane.f32.xlu1 %v969_v22 }
 0xae1   :  { %v751_v23 = vpop.xlane.xlu1 %750 }
 0xae2   :  { %970 = vrcp.f32 %v751_v23 }
 0xae8   :  { %v971_v24 = vpop.eup %970 }
 0xae9   :  { %v753_v25 = vmul.f32 %v971_v24, %v969_v22 }
 0xaeb   :  { %754 = vst [vmem:[#allocation11] sm:$0xff] %v753_v25 }
 0xaec   :  { %765 = dma.vmem_to_hbm [thread:$0]  %s761_s21, 128, %s763_s24, [#allocation5]  }
 0xaed   :  { %1098 = dma.done.wait [#allocation5], 128  }
 0xaee   :  { %1099 = vsyncadd [#allocation5], 4294967168 }
 0xaef   :  { %770 = vsyncpa [#allocation4], 1 }
 0xaf0   :  { %771 = vsyncpa [#allocation7], 1 }
 0xaf1   :  { %772 = vsyncpa [#allocation10], 1 }
 0xaf2   :  { %773 = vsyncpa [#allocation5], 1 }

</bundles_post_ra>
